<compile_context>
chip_gen: v6e
topology: v6e:2x2x1
jax: 0.10.0
libtpu: 0.0.40
codegen_flags: <defaults>
</compile_context>

<pallas_src>
import functools
import math

import jax
import jax.numpy as jnp
from jax.experimental import pallas as pl
from jax.experimental.pallas import tpu as pltpu


def _round_up(x, m):
    return ((x + m - 1) // m) * m


def _maybe_relu(x, apply_relu):
    return jnp.maximum(x, 0.0) if apply_relu else x


# ----------------------- hardware / capability probes ------------------------


@functools.lru_cache(maxsize=None)
def _vmem_capacity_bytes():
    try:
        return int(pltpu.get_tpu_info().vmem_capacity_bytes)
    except Exception:
        return 64 * 1024 * 1024        # conservative (v7x-sized) fallback


@functools.lru_cache(maxsize=None)
def _single_buffer_supported():
    """Probe pipeline_mode=pl.Buffered(1) for invariant operands."""
    try:
        def k(a_ref, o_ref):
            o_ref[...] = a_ref[...]

        x = jnp.zeros((8, 128), jnp.float32)
        out = pl.pallas_call(
            k,
            out_shape=jax.ShapeDtypeStruct((8, 128), jnp.float32),
            grid=(1,),
            in_specs=[pl.BlockSpec((8, 128), lambda *_: (0, 0),
                                   pipeline_mode=pl.Buffered(1))],
            out_specs=pl.BlockSpec((8, 128), lambda *_: (0, 0)),
        )(x)
        jax.block_until_ready(out)
        return True
    except Exception:
        return False


def _resident_spec(a):
    """Invariant operand: same block every step; single-buffer when supported."""
    idx = lambda *_: (0,) * a.ndim
    if _single_buffer_supported():
        return pl.BlockSpec(a.shape, idx, pipeline_mode=pl.Buffered(1))
    return pl.BlockSpec(a.shape, idx)


# ----------------------------- kernels ---------------------------------------


def _gc_fused_kernel(apply_relu, adj_ref, x_ref, w_ref, b_ref, o_ref, acc_ref):
    """o_tile = relu((adj_tile @ x) @ W + b), K-accumulated (din <= H_pad)."""
    k = pl.program_id(1)

    @pl.when(k == 0)
    def _():
        acc_ref[...] = jnp.zeros_like(acc_ref)

    acc_ref[...] += jnp.dot(adj_ref[...], x_ref[...],
                            preferred_element_type=jnp.float32)

    @pl.when(k == pl.num_programs(1) - 1)
    def _():
        o = jnp.dot(acc_ref[...].astype(jnp.bfloat16), w_ref[...],
                    preferred_element_type=jnp.float32) + b_ref[...]
        o_ref[...] = _maybe_relu(o, apply_relu).astype(o_ref.dtype)


def _gc_agg_kernel(apply_relu, adj_ref, s_ref, b_ref, o_ref, acc_ref):
    """o_tile = relu(adj_tile @ support + b), K-accumulated (din > H_pad)."""
    k = pl.program_id(1)

    @pl.when(k == 0)
    def _():
        acc_ref[...] = jnp.zeros_like(acc_ref)

    acc_ref[...] += jnp.dot(adj_ref[...], s_ref[...],
                            preferred_element_type=jnp.float32)

    @pl.when(k == pl.num_programs(1) - 1)
    def _():
        o = acc_ref[...] + b_ref[...]
        o_ref[...] = _maybe_relu(o, apply_relu).astype(o_ref.dtype)


def _matmul_kernel(x_ref, w_ref, o_ref):
    """support_tile = x_tile @ W (bf16 in / bf16 out, f32 accumulate)."""
    o_ref[...] = jnp.dot(x_ref[...], w_ref[...],
                         preferred_element_type=jnp.float32).astype(o_ref.dtype)


def _jk_fc_kernel(n_layer, mode, n_class, *refs):
    """Jumping-knowledge aggregation + Linear + masked log_softmax (row tile).

    refs ('cat'): x_0..x_{L-1}, fcw_0..fcw_{L-1}, fcb, out
    refs ('max'): x_0..x_{L-1}, fcw, fcb, out
    """
    x_refs = refs[:n_layer]
    if mode == "cat":
        fcw_refs = refs[n_layer:2 * n_layer]
        fcb_ref = refs[2 * n_layer]
        out_ref = refs[2 * n_layer + 1]
        logits = jnp.dot(x_refs[0][...], fcw_refs[0][...],
                         preferred_element_type=jnp.float32)
        for l in range(1, n_layer):
            logits += jnp.dot(x_refs[l][...], fcw_refs[l][...],
                              preferred_element_type=jnp.float32)
    else:  # "max": running elementwise max over layer outputs
        fcw_ref = refs[n_layer]
        fcb_ref = refs[n_layer + 1]
        out_ref = refs[n_layer + 2]
        h = x_refs[0][...]
        for l in range(1, n_layer):
            h = jnp.maximum(h, x_refs[l][...])
        logits = jnp.dot(h, fcw_ref[...], preferred_element_type=jnp.float32)
    logits = logits + fcb_ref[...]

    # Mask padded class lanes (logits stay f32, so -1e30 is safe).
    col = jax.lax.broadcasted_iota(jnp.int32, logits.shape, 1)
    logits = jnp.where(col < n_class, logits, jnp.float32(-1e30))

    m = jnp.max(logits, axis=1, keepdims=True)
    s = logits - m
    lse = jnp.log(jnp.sum(jnp.exp(s), axis=1, keepdims=True))
    out_ref[...] = (s - lse).astype(out_ref.dtype)


# --------------------------- pallas_call wrappers -----------------------------


def _gc_layer_call(adj_p, x_p, w_p, b_p, apply_relu, tm, tk, vmem_limit):
    n_pad = adj_p.shape[0]
    din = x_p.shape[1]
    h_pad = w_p.shape[1]
    grid2 = (n_pad // tm, n_pad // tk)

    params2 = pltpu.CompilerParams(
        dimension_semantics=("parallel", "arbitrary"),
        vmem_limit_bytes=int(vmem_limit))
    params1 = pltpu.CompilerParams(
        dimension_semantics=("parallel",),
        vmem_limit_bytes=int(vmem_limit))

    adj_spec = pl.BlockSpec((tm, tk), lambda i, k: (i, k))
    out_spec2 = pl.BlockSpec((tm, h_pad), lambda i, k: (i, 0))

    if din <= h_pad:
        cost = pl.CostEstimate(
            flops=2 * n_pad * n_pad * din + 2 * n_pad * din * h_pad,
            transcendentals=0,
            bytes_accessed=2 * (n_pad * n_pad + n_pad * din + din * h_pad
                                + n_pad * h_pad) + 4 * h_pad)
        return pl.pallas_call(
            functools.partial(_gc_fused_kernel, apply_relu),
            out_shape=jax.ShapeDtypeStruct((n_pad, h_pad), jnp.bfloat16),
            grid=grid2,
            in_specs=[adj_spec,
                      pl.BlockSpec((tk, din), lambda i, k: (k, 0)),
                      _resident_spec(w_p),
                      _resident_spec(b_p)],
            out_specs=out_spec2,
            scratch_shapes=[pltpu.VMEM((tm, din), jnp.float32)],
            compiler_params=params2,
            cost_estimate=cost,
        )(adj_p, x_p, w_p, b_p)

    # din > H_pad: support = x @ W once (row-tiled), then adj-aggregate with K grid.
    cost_s = pl.CostEstimate(
        flops=2 * n_pad * din * h_pad, transcendentals=0,
        bytes_accessed=2 * (n_pad * din + din * h_pad + n_pad * h_pad))
    support = pl.pallas_call(
        _matmul_kernel,
        out_shape=jax.ShapeDtypeStruct((n_pad, h_pad), jnp.bfloat16),
        grid=(n_pad // tm,),
        in_specs=[pl.BlockSpec((tm, din), lambda i: (i, 0)),
                  _resident_spec(w_p)],
        out_specs=pl.BlockSpec((tm, h_pad), lambda i: (i, 0)),
        compiler_params=params1,
        cost_estimate=cost_s,
    )(x_p, w_p)

    cost_a = pl.CostEstimate(
        flops=2 * n_pad * n_pad * h_pad, transcendentals=0,
        bytes_accessed=2 * (n_pad * n_pad + 2 * n_pad * h_pad) + 4 * h_pad)
    return pl.pallas_call(
        functools.partial(_gc_agg_kernel, apply_relu),
        out_shape=jax.ShapeDtypeStruct((n_pad, h_pad), jnp.bfloat16),
        grid=grid2,
        in_specs=[adj_spec,
                  pl.BlockSpec((tk, h_pad), lambda i, k: (k, 0)),
                  _resident_spec(b_p)],
        out_specs=out_spec2,
        scratch_shapes=[pltpu.VMEM((tm, h_pad), jnp.float32)],
        compiler_params=params2,
        cost_estimate=cost_a,
    )(adj_p, support, b_p)


def _jk_fc_call(xs_p, fcw_list, fcb_p, mode, n_class, tm, vmem_limit):
    n_pad, h_pad = xs_p[0].shape
    c_pad = fcb_p.shape[1]
    n_layer = len(xs_p)
    grid = (n_pad // tm,)

    tiled_x = pl.BlockSpec((tm, h_pad), lambda i: (i, 0))
    args = list(xs_p) + list(fcw_list) + [fcb_p]
    in_specs = ([tiled_x] * n_layer
                + [_resident_spec(w) for w in fcw_list]
                + [_resident_spec(fcb_p)])
    cost = pl.CostEstimate(
        flops=2 * len(fcw_list) * n_pad * h_pad * c_pad,
        transcendentals=n_pad * c_pad,
        bytes_accessed=2 * (n_layer * n_pad * h_pad + len(fcw_list) * h_pad * c_pad)
                       + 4 * (c_pad + n_pad * c_pad))
    return pl.pallas_call(
        functools.partial(_jk_fc_kernel, n_layer, mode, n_class),
        out_shape=jax.ShapeDtypeStruct((n_pad, c_pad), jnp.float32),
        grid=grid,
        in_specs=in_specs,
        out_specs=pl.BlockSpec((tm, c_pad), lambda i: (i, 0)),
        compiler_params=pltpu.CompilerParams(
            dimension_semantics=("parallel",),
            vmem_limit_bytes=int(vmem_limit)),
        cost_estimate=cost,
    )(*args)


# ------------------------------ planning --------------------------------------


def _plan_tiles(n, f_pad, h_pad, c_pad, n_layer, tile_m, tile_k):
    cap = _vmem_capacity_bytes()
    vmem_limit = int(0.75 * cap)          # ~96 MiB v5e/v6e, ~48 MiB v7x
    budget = vmem_limit - (8 << 20)       # headroom for compiler scratch / sems

    def kernel_bytes(tm, tk):
        est = []
        for din in {f_pad, h_pad}:
            fused = din <= h_pad
            stream_cols = din if fused else h_pad
            acc_cols = din if fused else h_pad
            est.append(2 * 2 * tm * tk                 # adj tile, bf16, dbl-buffered
                       + 2 * 2 * tk * stream_cols      # x / support stream
                       + 2 * din * h_pad               # resident weight (bf16)
                       + 4 * h_pad                     # bias (f32)
                       + 2 * 2 * tm * h_pad            # output tile, bf16, dbl
                       + 4 * tm * acc_cols)            # f32 accumulator scratch
            if not fused:                              # support precompute kernel
                est.append(2 * 2 * tm * din + 2 * din * h_pad + 2 * 2 * tm * h_pad)
        est.append(n_layer * 2 * 2 * tm * h_pad + n_layer * 2 * h_pad * c_pad
                   + 4 * c_pad + 2 * 4 * tm * c_pad)   # JK/FC kernel
        return max(est)

    n16 = _round_up(n, 16)
    if tile_m is None and tile_k is None and n16 <= 512:
        tm = tk = n16                       # whole graph in a single tile
    else:
        if tile_m is not None:
            tm = max(16, _round_up(tile_m, 16))
        else:
            tm = 128
            n128 = _round_up(n, 128)
            for cand in (512, 256):
                if (_round_up(n, cand) <= max(n128 + cand, int(1.25 * n128))
                        and kernel_bytes(cand, cand) <= budget):
                    tm = cand
                    break
        if tile_k is not None:
            tk = max(128, _round_up(tile_k, 128))
        else:
            tk = tm if tm % 128 == 0 else 128
    n_pad = _round_up(n, math.lcm(tm, tk))
    return tm, tk, n_pad, vmem_limit


# ------------------------------ forward --------------------------------------


def jknet_forward(feature, adj, params, mode="cat", tile_m=None, tile_k=None):
    n_layer = len(params["gc_w"])
    n, f = feature.shape
    h = params["gc_w"][0].shape[1]
    c = params["fc_b"].shape[-1]

    # Lane-friendly padded dims (full MXU columns, unmasked vector stores).
    f_pad = _round_up(f, 128)
    h_pad = _round_up(h, 128)
    c_pad = _round_up(c, 128)

    tm, tk, n_pad, vmem_limit = _plan_tiles(n, f_pad, h_pad, c_pad, n_layer,
                                            tile_m, tile_k)

    # bf16 in HBM for all MXU streams; padded rows/cols of adj are zero.
    # TODO(synk): for repeated inference on the same graph, pad/cast adj once
    # outside this function and reuse it instead of re-materializing per call.
    adj_p = jnp.pad(adj.astype(jnp.bfloat16), ((0, n_pad - n), (0, n_pad - n)))
    x_p = jnp.pad(feature.astype(jnp.bfloat16), ((0, n_pad - n), (0, f_pad - f)))

    xs = []
    for i in range(n_layer):
        w = params["gc_w"][i]
        b = params["gc_b"][i].astype(jnp.float32).reshape(1, -1)
        din = w.shape[0]
        din_pad = f_pad if i == 0 else h_pad
        w_p = jnp.pad(w.astype(jnp.bfloat16), ((0, din_pad - din), (0, h_pad - h)))
        b_p = jnp.pad(b, ((0, 0), (0, h_pad - h)))
        apply_relu = i < n_layer - 1
        # TODO(synk): F.dropout is identity in eval mode; training-mode dropout not implemented.
        x_p = _gc_layer_call(adj_p, x_p, w_p, b_p, apply_relu, tm, tk, vmem_limit)
        xs.append(x_p)

    fc_w = params["fc_w"]                                 # (fc_in, n_class)
    fc_b = params["fc_b"].astype(jnp.float32).reshape(1, -1)
    fcb_p = jnp.pad(fc_b, ((0, 0), (0, c_pad - c)))
    if mode == "cat":
        # Static per-layer slices of fc_w -> in-kernel logits accumulation
        # (mathematically identical to concat(xs) @ fc_w).
        fcw_list = [jnp.pad(fc_w[l * h:(l + 1) * h, :].astype(jnp.bfloat16),
                            ((0, h_pad - h), (0, c_pad - c)))
                    for l in range(n_layer)]
    else:
        fcw_list = [jnp.pad(fc_w.astype(jnp.bfloat16),
                            ((0, h_pad - h), (0, c_pad - c)))]

    out_p = _jk_fc_call(xs, fcw_list, fcb_p, mode, c, tm, vmem_limit)
    return out_p[:n, :c]


# --------------------------- reference & init --------------------------------


def jknet_reference(feature, adj, params, mode):
    """Pure-JAX reference mirroring the kernel's bf16 storage / f32 accumulate."""
    def bdot(a, b):
        return jnp.dot(a.astype(jnp.bfloat16), b.astype(jnp.bfloat16),
                       preferred_element_type=jnp.float32)

    def stor(x):  # bf16 HBM storage of activations / support
        return x.astype(jnp.bfloat16).astype(jnp.float32)

    n_layer = len(params["gc_w"])
    h = params["gc_w"][0].shape[1]
    h_pad = _round_up(h, 128)
    x = feature.astype(jnp.float32)
    xs = []
    for i in range(n_layer):
        w = params["gc_w"][i].astype(jnp.float32)
        b = params["gc_b"][i].astype(jnp.float32)
        din_pad = _round_up(w.shape[0], 128)
        if din_pad <= h_pad:
            x = bdot(bdot(adj, x), w) + b
        else:
            x = bdot(adj, stor(bdot(x, w))) + b
        if i < n_layer - 1:
            x = jnp.maximum(x, 0.0)
        x = stor(x)
        xs.append(x)

    fc_w = params["fc_w"].astype(jnp.float32)
    fc_b = params["fc_b"].astype(jnp.float32)
    if mode == "cat":
        logits = sum(bdot(xs[l], fc_w[l * h:(l + 1) * h, :]) for l in range(n_layer))
    else:
        hmax = xs[0]
        for t in xs[1:]:
            hmax = jnp.maximum(hmax, t)
        logits = bdot(hmax, fc_w)
    logits = logits + fc_b
    m = jnp.max(logits, axis=1, keepdims=True)
    s = logits - m
    return s - jnp.log(jnp.sum(jnp.exp(s), axis=1, keepdims=True))


def init_params(key, n_layer, n_feature, n_hidden, n_class, mode):
    """Deterministic synthetic parameter init (shapes match JKnet.__init__).

    GC weights stored as (dim_in, dim_out); fc weight stored as (in, out) so the
    kernel computes x @ W + b (equivalent to PyTorch Linear's x @ W.T + b).
    """
    keys = jax.random.split(key, 2 * n_layer + 2)
    gc_w, gc_b = [], []
    for i in range(n_layer):
        dim_in = n_feature if i == 0 else n_hidden
        scale = 1.0 / jnp.sqrt(dim_in)
        gc_w.append(scale * jax.random.normal(keys[2 * i], (dim_in, n_hidden), jnp.float32))
        gc_b.append(scale * jax.random.normal(keys[2 * i + 1], (n_hidden,), jnp.float32))
    fc_in = n_layer * n_hidden if mode == "cat" else n_hidden
    fscale = 1.0 / jnp.sqrt(fc_in)
    fc_w = fscale * jax.random.normal(keys[-2], (fc_in, n_class), jnp.float32)
    fc_b = fscale * jax.random.normal(keys[-1], (n_class,), jnp.float32)
    return {"gc_w": gc_w, "gc_b": gc_b, "fc_w": fc_w, "fc_b": fc_b}


# ------------------------------- demo -----------------------------------------


if __name__ == "__main__":
    root = jax.random.PRNGKey(0)

    def run_case(case_id, mode, n_layer, n_nodes, n_feature, n_hidden, n_class,
                 tile_m=None, tile_k=None):
        k_feat, k_adj, k_param = jax.random.split(jax.random.fold_in(root, case_id), 3)
        feature = jax.random.normal(k_feat, (n_nodes, n_feature), jnp.float32)
        # Symmetric, row-normalized adjacency-like matrix with self loops.
        a = jax.random.uniform(k_adj, (n_nodes, n_nodes), jnp.float32)
        a = 0.5 * (a + a.T) + jnp.eye(n_nodes, dtype=jnp.float32)
        adj = a / jnp.sum(a, axis=1, keepdims=True)
        params = init_params(k_param, n_layer, n_feature, n_hidden, n_class, mode)

        out = jknet_forward(feature, adj, params, mode=mode,
                            tile_m=tile_m, tile_k=tile_k)
        out = jax.block_until_ready(out)
        ref = jknet_reference(feature, adj, params, mode=mode)

        assert out.shape == (n_nodes, n_class)
        # log_softmax rows should sum to 1 in probability space.
        assert bool(jnp.allclose(jnp.sum(jnp.exp(out), axis=1), 1.0, atol=1e-3))
        max_diff = float(jnp.max(jnp.abs(out - ref)))
        assert bool(jnp.allclose(out, ref, atol=2e-2, rtol=2e-2)), max_diff
        return out

    # Case 1: 'cat', fused path, 3x3 grid (row tiles x K-accumulator tiles).
    run_case(0, "cat", n_layer=3, n_nodes=300, n_feature=64,
             n_hidden=32, n_class=4, tile_m=128, tile_k=128)
    # Case 2: 'max', support-precompute path for layer 0 (f_pad > h_pad), single tile.
    run_case(1, "max", n_layer=2, n_nodes=40, n_feature=200,
             n_hidden=16, n_class=5)
    # Case 3: tiny 'cat' sanity case.
    run_case(2, "cat", n_layer=2, n_nodes=16, n_feature=8,
             n_hidden=32, n_class=3)

    print("KERNEL_OK")
</pallas_src>

<mosaic_0001>
module attributes {stable_mosaic.version = 11 : i64} {
  func.func @k(%arg0: i32, %arg1: memref<8x128xf32, #tpu.memory_space<vmem>>, %arg2: memref<8x128xf32, #tpu.memory_space<vmem>>) attributes {dimension_semantics = [#tpu.dimension_semantics<arbitrary>], iteration_bounds = array<i64: 1>, scalar_prefetch = 0 : i64, scratch_operands = 0 : i64, tpu.core_type = #tpu.core_type<tc>, window_params = [{pipeline_mode = #tpu.pipeline_mode<synchronous>, transform_indices = @transform_0, window_bounds = array<i64: 8, 128>}, {pipeline_mode = #tpu.pipeline_mode<synchronous>, transform_indices = @transform_1, window_bounds = array<i64: 8, 128>}]} {
    %c0 = arith.constant 0 : index
    %c0_0 = arith.constant 0 : index
    %0 = vector.load %arg1[%c0, %c0_0] : memref<8x128xf32, #tpu.memory_space<vmem>>, vector<8x128xf32>
    %c0_1 = arith.constant 0 : index
    %c0_2 = arith.constant 0 : index
    %1 = vector.load %arg2[%c0_1, %c0_2] : memref<8x128xf32, #tpu.memory_space<vmem>>, vector<8x128xf32>
    tpu.vector_store %arg2[%c0_1, %c0_2], %0 {strides = array<i32>} : memref<8x128xf32, #tpu.memory_space<vmem>>, vector<8x128xf32>,
    return
  }
  func.func @transform_0(%arg0: i32) -> (i32, i32) {
    %c0_i32 = arith.constant 0 : i32
    %c0_i32_0 = arith.constant 0 : i32
    %c0_i32_1 = arith.constant 0 : i32
    return %c0_i32, %c0_i32_0 : i32, i32
  }
  func.func @transform_1(%arg0: i32) -> (i32, i32) {
    %c0_i32 = arith.constant 0 : i32
    %c0_i32_0 = arith.constant 0 : i32
    %c0_i32_1 = arith.constant 0 : i32
    return %c0_i32, %c0_i32_0 : i32, i32
  }
}

module attributes {stable_mosaic.version = 11 : i64} {
  func.func @_gc_fused_kernel(%arg0: i32, %arg1: i32, %arg2: memref<128x128xbf16, #tpu.memory_space<vmem>>, %arg3: memref<128x128xbf16, #tpu.memory_space<vmem>>, %arg4: memref<128x128xbf16, #tpu.memory_space<vmem>>, %arg5: memref<1x128xf32, #tpu.memory_space<vmem>>, %arg6: memref<128x128xbf16, #tpu.memory_space<vmem>>, %arg7: memref<128x128xf32, #tpu.memory_space<vmem>>) attributes {dimension_semantics = [#tpu.dimension_semantics<parallel>, #tpu.dimension_semantics<arbitrary>], iteration_bounds = array<i64: 3, 3>, scalar_prefetch = 0 : i64, scratch_operands = 1 : i64, tpu.core_type = #tpu.core_type<tc>, window_params = [{transform_indices = @transform_0, window_bounds = array<i64: 128, 128>}, {transform_indices = @transform_1, window_bounds = array<i64: 128, 128>}, {pipeline_mode = #tpu.pipeline_mode<synchronous>, transform_indices = @transform_2, window_bounds = array<i64: 128, 128>}, {pipeline_mode = #tpu.pipeline_mode<synchronous>, transform_indices = @transform_3, window_bounds = array<i64: 1, 128>}, {transform_indices = @transform_4, window_bounds = array<i64: 128, 128>}]} {
    %c0_i32 = arith.constant 0 : i32
    %0 = arith.cmpi eq, %arg1, %c0_i32 : i32
    %1 = arith.extui %0 : i1 to i32
    %c0_i32_0 = arith.constant 0 : i32
    %2 = arith.cmpi ne, %1, %c0_i32_0 : i32
    scf.if %2 {
      %cst_9 = arith.constant 0.000000e+00 : f32
      %12 = vector.broadcast %cst_9 : f32 to vector<128x128xf32>
      %c0_10 = arith.constant 0 : index
      %c0_11 = arith.constant 0 : index
      %13 = vector.load %arg7[%c0_10, %c0_11] : memref<128x128xf32, #tpu.memory_space<vmem>>, vector<128x128xf32>
      tpu.vector_store %arg7[%c0_10, %c0_11], %12 {strides = array<i32>} : memref<128x128xf32, #tpu.memory_space<vmem>>, vector<128x128xf32>,
    } else {
    }
    %c0 = arith.constant 0 : index
    %c0_1 = arith.constant 0 : index
    %3 = vector.load %arg7[%c0, %c0_1] : memref<128x128xf32, #tpu.memory_space<vmem>>, vector<128x128xf32>
    %c0_2 = arith.constant 0 : index
    %c0_3 = arith.constant 0 : index
    %4 = vector.load %arg2[%c0_2, %c0_3] : memref<128x128xbf16, #tpu.memory_space<vmem>>, vector<128x128xbf16>
    %c0_4 = arith.constant 0 : index
    %c0_5 = arith.constant 0 : index
    %5 = vector.load %arg3[%c0_4, %c0_5] : memref<128x128xbf16, #tpu.memory_space<vmem>>, vector<128x128xbf16>
    %cst = arith.constant dense<0.000000e+00> : vector<128x128xf32>
    %6 = tpu.matmul %4, %5, %cst {dimension_numbers = #tpu.dot_dimension_numbers<[1], [0], [0], [1], [0, 0, 1, 1], [], []>} : vector<128x128xbf16>, vector<128x128xbf16>, vector<128x128xf32> -> vector<128x128xf32>
    %7 = arith.addf %3, %6 : vector<128x128xf32>
    %c0_6 = arith.constant 0 : index
    %c0_7 = arith.constant 0 : index
    %8 = vector.load %arg7[%c0_6, %c0_7] : memref<128x128xf32, #tpu.memory_space<vmem>>, vector<128x128xf32>
    tpu.vector_store %arg7[%c0_6, %c0_7], %7 {strides = array<i32>} : memref<128x128xf32, #tpu.memory_space<vmem>>, vector<128x128xf32>,
    %c2_i32 = arith.constant 2 : i32
    %9 = arith.cmpi eq, %arg1, %c2_i32 : i32
    %10 = arith.extui %9 : i1 to i32
    %c0_i32_8 = arith.constant 0 : i32
    %11 = arith.cmpi ne, %10, %c0_i32_8 : i32
    scf.if %11 {
      %c0_9 = arith.constant 0 : index
      %c0_10 = arith.constant 0 : index
      %12 = vector.load %arg7[%c0_9, %c0_10] : memref<128x128xf32, #tpu.memory_space<vmem>>, vector<128x128xf32>
      %13 = arith.truncf %12 : vector<128x128xf32> to vector<128x128xbf16>
      %c0_11 = arith.constant 0 : index
      %c0_12 = arith.constant 0 : index
      %14 = vector.load %arg4[%c0_11, %c0_12] : memref<128x128xbf16, #tpu.memory_space<vmem>>, vector<128x128xbf16>
      %cst_13 = arith.constant dense<0.000000e+00> : vector<128x128xf32>
      %15 = tpu.matmul %13, %14, %cst_13 {dimension_numbers = #tpu.dot_dimension_numbers<[1], [0], [0], [1], [0, 0, 1, 1], [], []>} : vector<128x128xbf16>, vector<128x128xbf16>, vector<128x128xf32> -> vector<128x128xf32>
      %c0_14 = arith.constant 0 : index
      %c0_15 = arith.constant 0 : index
      %16 = vector.load %arg5[%c0_14, %c0_15] : memref<1x128xf32, #tpu.memory_space<vmem>>, vector<1x128xf32>
      %17 = vector.broadcast %16 : vector<1x128xf32> to vector<128x128xf32>
      %18 = arith.addf %15, %17 : vector<128x128xf32>
      %cst_16 = arith.constant 0.000000e+00 : f32
      %19 = vector.broadcast %cst_16 : f32 to vector<128x128xf32>
      %20 = arith.maximumf %18, %19 : vector<128x128xf32>
      %21 = arith.truncf %20 : vector<128x128xf32> to vector<128x128xbf16>
      %c0_17 = arith.constant 0 : index
      %c0_18 = arith.constant 0 : index
      %22 = vector.load %arg6[%c0_17, %c0_18] : memref<128x128xbf16, #tpu.memory_space<vmem>>, vector<128x128xbf16>
      tpu.vector_store %arg6[%c0_17, %c0_18], %21 {strides = array<i32>} : memref<128x128xbf16, #tpu.memory_space<vmem>>, vector<128x128xbf16>,
    } else {
    }
    return
  }
  func.func @transform_0(%arg0: i32, %arg1: i32) -> (i32, i32) {
    %c0_i32 = arith.constant 0 : i32
    return %arg0, %arg1 : i32, i32
  }
  func.func @transform_1(%arg0: i32, %arg1: i32) -> (i32, i32) {
    %c0_i32 = arith.constant 0 : i32
    %c0_i32_0 = arith.constant 0 : i32
    return %arg1, %c0_i32 : i32, i32
  }
  func.func @transform_2(%arg0: i32, %arg1: i32) -> (i32, i32) {
    %c0_i32 = arith.constant 0 : i32
    %c0_i32_0 = arith.constant 0 : i32
    %c0_i32_1 = arith.constant 0 : i32
    return %c0_i32, %c0_i32_0 : i32, i32
  }
  func.func @transform_3(%arg0: i32, %arg1: i32) -> (i32, i32) {
    %c0_i32 = arith.constant 0 : i32
    %c0_i32_0 = arith.constant 0 : i32
    %c0_i32_1 = arith.constant 0 : i32
    return %c0_i32, %c0_i32_0 : i32, i32
  }
  func.func @transform_4(%arg0: i32, %arg1: i32) -> (i32, i32) {
    %c0_i32 = arith.constant 0 : i32
    %c0_i32_0 = arith.constant 0 : i32
    return %arg0, %c0_i32 : i32, i32
  }
}

</mosaic_0001>

<bundles_post_ra>
// kernel: tpu_custom_call.1
= control target key start
LH: loop header
LB: loop body
LE: loop exit
PB: predicated region body
PF: predicated region fallthrough
CT: control target
= control target key end

     0   :  { %6 = vsyncpa [#allocation3], 0  ;;  %s102_s0 = inlined_call_operand.hbm [shape: f32[8,128], index: 0, kind: input, shape index: {}]   ;;  %s103_s1 = inlined_call_operand.hbm [shape: f32[8,128], index: 1, kind: output, shape index: {}]  }
   0x1   :  { %7 = vsyncpa [#allocation4], 0  ;;  %s84_s6 = smov [#allocation2]  }
   0x2   :  { %s14_s7 = sshll.u32 %s84_s6, 4  ;;  %s15_s7 = int_to_ptr.vmem [resolvable:$true] %s14_s7 }
   0x3   :  { %s48_s8 = scalar_lea.vmem %s15_s7, 128  ;;  %p53_p1 = scmp.lt.s32.totalorder %s15_s7, %s15_s7 }
   0x4   :  { %p49_p0 = scmp.ne.s32.totalorder %s15_s7, %s48_s8  ;;  %p54_p2 = scmp.lt.s32.totalorder %s48_s8, %s48_s8 }
   0x6   :  { %p55_p3 = por %p54_p2, %p53_p1 }
   0x8   :  { %p56_p4 = pnand %p55_p3, %p49_p0 }
   0xa   :  { %59 = shalt.err (!%p56_p4)
}
   0xb   :  { %17 = dma.hbm_to_vmem [thread:$0]  %s102_s0, 128, %s15_s7, [#allocation3]  }
   0xc   :  { %80 = dma.done.wait [#allocation3], 128  }
   0xd   :  { %81 = vsyncadd [#allocation3], 4294967168  ;;  %s85_s11 = smov [#allocation5]   ;;  %v21_v0 = vld [vmem:[#allocation2] sm:$0xff] }
   0xe   :  { %s29_s12 = sshll.u32 %s85_s11, 4  ;;  %22 = vst [vmem:[#allocation5] sm:$0xff] %v21_v0  ;;  %s30_s12 = int_to_ptr.vmem [resolvable:$true] %s29_s12 }
   0xf   :  { %s60_s13 = scalar_lea.vmem %s30_s12, 128  ;;  %p65_p6 = scmp.lt.s32.totalorder %s30_s12, %s30_s12 }
  0x10   :  { %p61_p5 = scmp.ne.s32.totalorder %s30_s12, %s60_s13  ;;  %p66_p7 = scmp.lt.s32.totalorder %s60_s13, %s60_s13 }
  0x12   :  { %p67_p8 = por %p66_p7, %p65_p6 }
  0x14   :  { %p68_p9 = pnand %p67_p8, %p61_p5 }
  0x16   :  { %71 = shalt.err (!%p68_p9)
}
  0x17   :  { %32 = dma.vmem_to_hbm [thread:$0]  %s30_s12, 128, %s103_s1, [#allocation4]  }
  0x18   :  { %82 = dma.done.wait [#allocation4], 128  }
  0x19   :  { %83 = vsyncadd [#allocation4], 4294967168 }
  0x1a   :  { %36 = vsyncpa [#allocation3], 1 }
  0x1b   :  { %37 = vsyncpa [#allocation4], 1 }

// kernel: tpu_custom_call.1
= control target key start
LH: loop header
LB: loop body
LE: loop exit
PB: predicated region body
PF: predicated region fallthrough
CT: control target
= control target key end

     0   :  { %s2050_s0 = inlined_call_operand.hbm [shape: bf16[384,384], index: 0, kind: input, shape index: {}]   ;;  %s2051_s1 = inlined_call_operand.hbm [shape: bf16[384,128], index: 1, kind: input, shape index: {}]   ;;  %s2052_s2 = inlined_call_operand.hbm [shape: bf16[128,128], index: 2, kind: input, shape index: {}]   ;;  %s2053_s3 = inlined_call_operand.vmem [shape: f32[1,128], index: 3, kind: input, shape index: {}]   ;;  %s2054_s4 = inlined_call_operand.hbm [shape: bf16[384,128], index: 4, kind: output, shape index: {}]  }
   0x1   :  { %2074 = sst [smem:[#allocation23_spill]] %s2052_s2 }
   0x2   :  { %2075 = sst [smem:[#allocation24_spill]] %s2053_s3 }
   0x3   :  { %2076 = sst [smem:[#allocation25_spill]] %s2054_s4 }
   0x4   :  { %9 = vsyncpa [#allocation4], 0 }
   0x5   :  { %11 = vsyncpa [#allocation4 + $0x1], 0 }
   0x6   :  { %12 = vsyncpa [#allocation7], 0 }
   0x7   :  { %14 = vsyncpa [#allocation7 + $0x1], 0 }
   0x8   :  { %15 = vsyncpa [#allocation5], 0 }
   0x9   :  { %17 = vsyncpa [#allocation5 + $0x1], 0  ;;  %s1709_s15 = smov 0   ;;  %s1711_s16 = smov 0  }
   0xa   :  { %s1713_s17 = smov 0   ;;  %s1715_s18 = smov 0  }
   0xb   :  { %s1717_s19 = smov 0   ;;  %s1719_s20 = smov 0  }
   0xc   :  { %s1721_s21 = smov 0   ;;  %s1723_s22 = smov 0  }
   0xd   :  { %s1725_s23 = smov 0   ;;  %s1727_s24 = smov 0  }
   0xe   :  { %s1729_s25 = smov 0   ;;  %s1731_s26 = smov 0  }
   0xf   :  { %s1733_s27 = smov 0   ;;  %s1735_s28 = smov 0  }
  0x10 LB: > { %2077 = sst [smem:[#allocation14_spill]] %s1620_s15  ;;  %s1776_s29 = sadd.s32 4294967295, %s1672_s28   ;;  %s1672_s28 = sphi %s1735_s28, %s23_s28   ;;  %s1668_s27 = sphi %s1733_s27, %s2132_s27   ;;  %s1664_s26 = sphi %s1731_s26, %s2131_s26   ;;  %s1660_s25 = sphi %s1729_s25, %s2130_s25   ;;  %s1656_s24 = sphi %s1727_s24, %s2129_s24   ;;  %s1652_s23 = sphi %s1725_s23, %s2128_s23   ;;  %s1648_s22 = sphi %s1723_s22, %s2127_s22   ;;  %s1644_s21 = sphi %s1721_s21, %s2126_s21   ;;  %s1640_s20 = sphi %s1719_s20, %s2125_s20   ;;  %s1636_s19 = sphi %s1717_s19, %s2124_s19   ;;  %s1632_s18 = sphi %s1715_s18, %s2123_s18   ;;  %s1628_s17 = sphi %s1713_s17, %s2122_s17   ;;  %s1624_s16 = sphi %s1711_s16, %s2121_s16   ;;  %s1620_s15 = sphi %s1709_s15, %s2120_s15  }
  0x11   : > { %2078 = sst [smem:[#allocation15_spill]] %s1624_s16  ;;  %s1008_s30 = sadd.s32 4294967294, %s1672_s28  }
  0x12   : > { %2079 = sst [smem:[#allocation16_spill]] %s1656_s24  ;;  %p57_p0 = scmp.ne.s32.totalorder %s1648_s22, %s1644_s21 }
  0x13   : > { %2080 = sst [smem:[#allocation17_spill]] %s1660_s25  ;;  %p2073_p1 = scmp.eq.s32.totalorder %s1776_s29, 0 }
  0x14   : > { %2081 = sst [smem:[#allocation18_spill]] %s1776_s29  ;;  %p83_p2 = scmp.ne.s32.totalorder %s1636_s19, %s1632_s18 }
  0x15   : > { %p1785_p3 = por %p2073_p1, %p57_p0  ;;  %p148_p4 = scmp.ne.s32.totalorder %s1628_s17, %s1624_s16 }
  0x16   : > { %p1793_p5 = por %p83_p2, %p2073_p1  ;;  %p149_p6 = scmp.eq.s32.totalorder %s1776_s29, 8 }
  0x17   : > { %p154_p7 = scmp.ne.s32.totalorder %s1624_s16, %s1620_s15  ;;  %p155_p8 = scmp.eq.s32.totalorder %s1008_s30, 8 }
  0x18   : > { %s2083_s7 = scalar_select %p1793_p5, 1, 0 }
  0x19   : > { %p1800_p9 = por %p149_p6, %p148_p4  ;;  %p1009_p10 = scmp.ge.s32.totalorder %s1672_s28, 1 }
  0x1a   : > { %2084 = sst [smem:[#allocation19_spill]] %s2083_s7  ;;  %p1805_p11 = por %p155_p8, %p154_p7 }
  0x1b   : > { %s2085_s8 = scalar_select %p1800_p9, 1, 0 }
  0x1c   : > { %s2087_s9 = scalar_select %p1805_p11, 1, 0 }
  0x1d   : > { %2086 = sst [smem:[#allocation20_spill]] %s2085_s8  ;;  %p162_p12 = scmp.lt.s32.totalorder %s1672_s28, 10 }
  0x1e   : > { %2088 = sst [smem:[#allocation21_spill]] %s2087_s9  ;;  %s1674_s11 = smov [#allocation8]  }
  0x1f   : > { %p1810_p13 = pnand %p1009_p10, %p162_p12  ;;  %s174_s12 = sshll.u32 %s1674_s11, 4  ;;  %s175_s12 = int_to_ptr.vmem [resolvable:$true] %s174_s12 }
  0x20   : > { %s1449_s13 = scalar_lea.vmem %s175_s12, 1024  ;;  %p1457_p9 = scmp.lt.s32.totalorder %s175_s12, %s175_s12 }
  0x21   : > { %p1276_p0 = pneg %p1810_p13  ;;  %p1450_p6 = scmp.ne.s32.totalorder %s175_s12, %s1449_s13 }
  0x22   : > { %p1458_p11 = scmp.lt.s32.totalorder %s1449_s13, %s1449_s13 }
  0x23   : > { %p1277_p2 = pnand %p1276_p0, %p2073_p1 }
  0x24   : > { %p1459_p5 = por %p1458_p11, %p1457_p9 }
  0x25   : > { %p1440_p4 = pneg %p1277_p2 }
  0x27   : > { %p1452_p7 = pnand %p1450_p6, %p1440_p4 }
  0x29   : > { %p1453_p8 = pneg %p1452_p7 }
  0x2b   : > { %p1460_p10 = pnand %p1459_p5, %p1453_p8 }
  0x2d   : > { %1463 = shalt.err (!%p1460_p10)
}
  0x2e   : > { %s2058_s14 = smov 64   ;;  %s2060_s18 = smov 4  }
  0x2f   : > { %s2090_s2 = sld [smem:[#allocation23_spill]]  ;;  %s32_s11 = sadd.s32 1, %s1664_s26 }
  0x30   : > { %p33_p5 = scmp.ge.s32.totalorder %s32_s11, 3  ;;  %s35_s13 = sadd.s32 1, %s1668_s27 }
  0x31   : > { %s44_s5 = sadd.s32 1, %s1652_s23  ;;  %p51_p9 = scmp.ne.s32.totalorder %s1652_s23, %s1648_s22 }
  0x32   : > { %s2134_s11 = smov (%p33_p5, %s32_s11), 0  ;;  %s2136_s13 = smov (!%p33_p5, %s35_s13), %s1668_s27 }
  0x33   : > { %2091 = sst [smem:[#allocation22_spill]] %s2134_s11  ;;  %s1834_s9 = ssub.s32 %s1664_s26, %s2134_s11 }
  0x34   : > { %p52_p11 = scmp.eq.s32.totalorder %s1672_s28, 0  ;;  %p37_p12 = scmp.ge.s32.totalorder %s2136_s13, 3 }
  0x35   : > { %1279 = dma.hbm_to_vmem [thread:$0]  (!%p1277_p2), %s2090_s2, 1024, %s175_s12, [#allocation7], %s2058_s14, %s2058_s14, %s2060_s18  }
  0x36   : > { %p68_p0 = scmp.eq.s32.totalorder %s1834_s9, 0  ;;  %p1840_p2 = por %p52_p11, %p51_p9 }
  0x37   : > { %p1292_p4 = scmp.lt.s32.totalorder %s1672_s28, 9  ;;  %s2138_s13 = smov (%p37_p12, %s2136_s13), 0 }
  0x38   : > { %s191_s21 = sand.u32 1, %s1652_s23   ;;  %s1265_s30 = smul.u32 48, %s1668_s27 }
  0x39   : > { %s39_s14 = ssub.s32 %s1668_s27, %s2138_s13  ;;  %s1012_s2 = sshll.u32 %s191_s21, 6 }
  0x3a   : > { %s41_s18 = sor.u32 %s1834_s9, %s39_s14  ;;  %p136_p6 = scmp.eq.s32.totalorder %s39_s14, 0 }
  0x3b   : > { %p42_p7 = scmp.eq.s32.totalorder %s41_s18, 0  ;;  %s2093_s11 = sadd.s32 1, %s1628_s17 }
  0x3c   : > { %s1855_s15 = scalar_select %p136_p6, %s1628_s17, %s2093_s11  }
  0x3d   : > { %s1858_s4 = scalar_select %p42_p7, %s1652_s23, %s44_s5  }
  0x3e   : > { %s201_s8 = sadd.s32 %s1664_s26, %s1265_s30  ;;  %s195_s3 = scalar_lea.vmem [#allocation3], %s1012_s2 }
  0x3f   : > { %s1015_s25 = sshll.u32 %s201_s8, 6  ;;  %s204_s24 = sshll.u32 %s195_s3, 4  ;;  %s205_s24 = int_to_ptr.vmem [resolvable:$true] %s204_s24 }
  0x40   : > { %s203_s29 = scalar_lea.hbm %s2050_s0, %s1015_s25  ;;  %p1868_p8 = pnand %p1292_p4, %p1840_p2 }
  0x41   : > { %s192_s11 = scalar_lea.sflag [#allocation4], %s191_s21  ;;  %s1477_s5 = scalar_lea.vmem %s205_s24, 1024 }
  0x42   : > { %p1466_p10 = pneg %p1868_p8  ;;  %p1478_p5 = scmp.ne.s32.totalorder %s205_s24, %s1477_s5 }
  0x43   : > { %s1677_s2 = smov [#allocation3]  }
  0x44   : > { %p1480_p9 = pnand %p1478_p5, %p1466_p10  ;;  %s1482_s3 = sshll.u32 %s1677_s2, 4  ;;  %s1483_s3 = int_to_ptr.vmem [resolvable:$false] %s1482_s3 }
  0x45   : > { %s1484_s16 = scalar_lea.vmem %s1483_s3, 2048  ;;  %p1485_p6 = scmp.lt.s32.totalorder %s205_s24, %s1483_s3 }
  0x46   : > { %p1481_p12 = pneg %p1480_p9  ;;  %p1486_p7 = scmp.lt.s32.totalorder %s1484_s16, %s1477_s5 }
  0x48   : > { %p1487_p1 = por %p1486_p7, %p1485_p6 }
  0x4a   : > { %p1488_p2 = pnand %p1487_p1, %p1481_p12 }
  0x4c   : > { %1491 = shalt.err (!%p1488_p2)
}
  0x4d   : > { %s1678_s25 = smov 192   ;;  %s2095_s7 = smov 4  }
  0x4e   : > { %s2096_s8 = smov 64   ;;  %s70_s12 = sadd.s32 1, %s1640_s20 }
  0x4f   : > { %1283 = dma.hbm_to_vmem [thread:$0]  (!%p1868_p8), %s203_s29, 1024, %s205_s24, %s192_s11, %s1678_s25, %s2096_s8, %s2095_s7  }
  0x50   : > { %p77_p10 = scmp.ne.s32.totalorder %s1640_s20, %s1636_s19  ;;  %s216_s30 = sand.u32 1, %s1640_s20  }
  0x51   : > { %s1885_s21 = scalar_select %p68_p0, %s1640_s20, %s70_s12  }
  0x52   : > { %p79_p1 = por %p77_p10, %p52_p11  ;;  %s1072_s14 = sshll.u32 %s1664_s26, 10 }
  0x53   : > { %s1016_s5 = sshll.u32 %s216_s30, 6  ;;  %s224_s16 = scalar_lea.hbm %s2051_s1, %s1072_s14 }
  0x54   : > { %p1896_p5 = pnand %p1292_p4, %p79_p1  ;;  %s218_s24 = scalar_lea.vmem [#allocation6], %s1016_s5 }
  0x55   : > { %s225_s29 = sshll.u32 %s218_s24, 4  ;;  %s2098_s9 = sand.u32 1, %s1672_s28   ;;  %s226_s29 = int_to_ptr.vmem [resolvable:$true] %s225_s29 }
  0x56   : > { %s215_s11 = scalar_lea.sflag [#allocation7], %s2098_s9  ;;  %p1494_p11 = pneg %p1896_p5 }
  0x57   : > { %s1505_s25 = scalar_lea.vmem %s226_s29, 1024  ;;  %s1679_s12 = smov [#allocation6]  }
  0x58   : > { %p1506_p0 = scmp.ne.s32.totalorder %s226_s29, %s1505_s25  ;;  %s1510_s30 = sshll.u32 %s1679_s12, 4  ;;  %s1511_s30 = int_to_ptr.vmem [resolvable:$false] %s1510_s30 }
  0x59   : > { %s1512_s14 = scalar_lea.vmem %s1511_s30, 2048  ;;  %p1513_p4 = scmp.lt.s32.totalorder %s226_s29, %s1511_s30 }
  0x5a   : > { %p1508_p8 = pnand %p1506_p0, %p1494_p11  ;;  %p1514_p12 = scmp.lt.s32.totalorder %s1512_s14, %s1505_s25 }
  0x5c   : > { %p1509_p9 = pneg %p1508_p8  ;;  %p1515_p6 = por %p1514_p12, %p1513_p4 }
  0x5e   : > { %p1516_p7 = pnand %p1515_p6, %p1509_p9 }
  0x60   : > { %1519 = shalt.err (!%p1516_p7)
}
  0x61   : > { %1286 = dma.hbm_to_vmem [thread:$0]  (!%p1896_p5), %s224_s16, 1024, %s226_s29, %s215_s11, %s2096_s8, %s2096_s8, %s2095_s7  }
  0x62   : > { %237 = sbr.rel (%p1810_p13) target bundleno = 658 (0x292), region = 36  ;;  %s239_s5 = sand.u32 (!%p1810_p13), 1, %s1648_s22  }
  0x63   : > { %s1020_s2 = sshll.u32 (!%p1810_p13), %s239_s5, 6  ;;  %s240_s3 = scalar_lea.sflag (!%p1810_p13), [#allocation4], %s239_s5 }
  0x64   : > { %s1912_s24 = scalar_lea.vmem (!%p1810_p13), [#allocation3], %s1020_s2 }
  0x67   : > { %1603 = dma.done.wait (%p1785_p3), %s240_s3, 1024  }
  0x68   : > { %1605 = vsyncadd (%p1785_p3), %s240_s3, 4294966272  ;;  %s2099_s18 = sld [smem:[#allocation18_spill]]  ;;  %s250_s7 = sand.u32 1, %s1636_s19  }
  0x69   : > { %s2100_s9 = sld [smem:[#allocation19_spill]]  ;;  %s1021_s8 = sshll.u32 %s250_s7, 6 }
  0x6a   : > { %s1920_s16 = scalar_lea.vmem [#allocation6], %s1021_s8 }
  0x6e   : > { %s248_s25 = sand.u32 1, %s2099_s18  }
  0x6f   : > { %s249_s10 = scalar_lea.sflag [#allocation7], %s248_s25  ;;  %p2101_p13 = scmp.ne.s32.totalorder %s2100_s9, 0 }
  0x71   : > { %1607 = dma.done.wait (%p2101_p13), %s249_s10, 1024  }
  0x72   : > { %1609 = vsyncadd (%p2101_p13), %s249_s10, 4294966272  ;;  %p2102_p2 = scmp.eq.s32.totalorder %s2099_s18, 0 }
  0x74   : > { %1611 = dma.done.wait (%p2102_p2), [#allocation7], 1024   ;;  %p2103_p10 = pmov %p2102_p2 }
  0x75   : > { %s2104_s6 = sld [smem:[#allocation15_spill]] }
  0x76   : > { %1613 = vsyncadd (%p2103_p10), [#allocation7], 4294966272  ;;  %s2105_s30 = sld [smem:[#allocation16_spill]] }
  0x7b   : > { %s283_s29 = sand.u32 1, %s2104_s6  }
  0x7c   : > { %s1023_s11 = sshll.u32 %s283_s29, 6  ;;  %p1024_p3 = scmp.ne.s32.totalorder %s2105_s30, 0 }
  0x7d   : > { %s1933_s12 = scalar_lea.vmem [#allocation9], %s1023_s11 }
  0x7e   : > { %293 = sbr.rel (%p1024_p3) target bundleno = 140 (0x8c), region = 52 }
  0x83   : > { %v1680_v0 = vmov 0.0  }
  0x84   : > { %294 = vst [vmem:[#allocation2 + $0x30] sm:$0xff] %v1680_v0  ;;  %295 = vst [vmem:[#allocation2] sm:$0xff] %v1680_v0 }
  0x85   : > { %296 = vst [vmem:[#allocation2 + $0x58] sm:$0xff] %v1680_v0  ;;  %297 = vst [vmem:[#allocation2 + $0x18] sm:$0xff] %v1680_v0 }
  0x86   : > { %298 = vst [vmem:[#allocation2 + $0x50] sm:$0xff] %v1680_v0  ;;  %299 = vst [vmem:[#allocation2 + $0x68] sm:$0xff] %v1680_v0 }
  0x87   : > { %300 = vst [vmem:[#allocation2 + $0x8] sm:$0xff] %v1680_v0  ;;  %301 = vst [vmem:[#allocation2 + $0x48] sm:$0xff] %v1680_v0 }
  0x88   : > { %302 = vst [vmem:[#allocation2 + $0x40] sm:$0xff] %v1680_v0  ;;  %303 = vst [vmem:[#allocation2 + $0x20] sm:$0xff] %v1680_v0 }
  0x89   : > { %304 = vst [vmem:[#allocation2 + $0x10] sm:$0xff] %v1680_v0  ;;  %305 = vst [vmem:[#allocation2 + $0x38] sm:$0xff] %v1680_v0 }
  0x8a   : > { %306 = vst [vmem:[#allocation2 + $0x60] sm:$0xff] %v1680_v0  ;;  %307 = vst [vmem:[#allocation2 + $0x70] sm:$0xff] %v1680_v0 }
  0x8b   : > { %308 = vst [vmem:[#allocation2 + $0x78] sm:$0xff] %v1680_v0  ;;  %309 = vst [vmem:[#allocation2 + $0x28] sm:$0xff] %v1680_v0 }
  0x8c PF: > { %v1414_v1 = vld [vmem:[%s1920_s16 + $0x38] sm:$0xff]   ;;  %v1415_v2 = vld [vmem:[%s1920_s16 + $0x30] sm:$0xff]   ;;  %v1416_v3 = vld [vmem:[%s1920_s16 + $0x28] sm:$0xff]   ;;  %s2106_s14 = sld [smem:[#allocation16_spill]] }
  0x8d   : > { %1169 = vmatprep.subr.bf16.mxu0 %v1414_v1  ;;  %1233 = vmatprep.subr.bf16.mxu1 %v1414_v1  ;;  %v1417_v4 = vld [vmem:[%s1920_s16 + $0x20] sm:$0xff]   ;;  %v1418_v7 = vld [vmem:[%s1920_s16 + $0x18] sm:$0xff]   ;;  %v1419_v8 = vld [vmem:[%s1920_s16 + $0x10] sm:$0xff]  }
  0x8e   : > { %1170 = vmatpush3.bf16.msra.mxu0 %v1414_v1  ;;  %1241 = vmatpush3.bf16.msra.mxu1 %v1414_v1  ;;  %v1422_v5 = vld [vmem:[%s1912_s24] sm:$0xff]   ;;  %v1420_v9 = vld [vmem:[%s1920_s16 + $0x8] sm:$0xff]   ;;  %v1426_v13 = vld [vmem:[%s1912_s24 + $0x10] sm:$0xff]  }
  0x8f   : > { %1171 = vmatprep.subr.bf16.mxu0 %v1415_v2  ;;  %1234 = vmatprep.subr.bf16.mxu1 %v1415_v2  ;;  %v1423_v6 = vld [vmem:[%s1912_s24 + $0x20] sm:$0xff]   ;;  %v1424_v11 = vld [vmem:[%s1912_s24 + $0x8] sm:$0xff]   ;;  %v1427_v14 = vld [vmem:[%s1912_s24 + $0x30] sm:$0xff]  }
  0x90   : > { %1185 = vmatprep.mubr.bf16.mxu0 %v1422_v5  ;;  %1193 = vmatprep.mubr.bf16.mxu1 %v1423_v6  ;;  %v1421_v10 = vld [vmem:[%s1920_s16] sm:$0xff]   ;;  %v1425_v12 = vld [vmem:[%s1912_s24 + $0x28] sm:$0xff]   ;;  %v1428_v15 = vld [vmem:[%s1912_s24 + $0x18] sm:$0xff]  }
  0x91   : > { %v1429_v16 = vld [vmem:[%s1912_s24 + $0x38] sm:$0xff]   ;;  %v320_v18 = vld [vmem:[#allocation2 + $0x10] sm:$0xff]  ;;  %v318_v22 = vld [vmem:[#allocation2 + $0x40] sm:$0xff] }
  0x92   : > { %1172 = vmatpush3.bf16.msra.mxu0 %v1415_v2  ;;  %1242 = vmatpush3.bf16.msra.mxu1 %v1415_v2  ;;  %v312_v17 = vld [vmem:[#allocation2 + $0x58] sm:$0xff]  ;;  %v310_v21 = vld [vmem:[#allocation2 + $0x30] sm:$0xff]  ;;  %v311_v33 = vld [vmem:[#allocation2] sm:$0xff]  ;;  %p1041_p1 = scmp.ne.s32.totalorder %s2106_s14, 2 }
  0x93   : > { %1173 = vmatprep.subr.bf16.mxu0 %v1416_v3  ;;  %1235 = vmatprep.subr.bf16.mxu1 %v1416_v3  ;;  %v313_v27 = vld [vmem:[#allocation2 + $0x18] sm:$0xff]  ;;  %v319_v34 = vld [vmem:[#allocation2 + $0x20] sm:$0xff]  ;;  %v316_v39 = vld [vmem:[#allocation2 + $0x8] sm:$0xff]  ;;  %s2107_s3 = sld [smem:[#allocation24_spill]] (!%p1041_p1) }
  0x94   : > { %v321_v28 = vld [vmem:[#allocation2 + $0x38] sm:$0xff]  ;;  %v314_v45 = vld [vmem:[#allocation2 + $0x50] sm:$0xff]  ;;  %v322_v46 = vld [vmem:[#allocation2 + $0x60] sm:$0xff] }
  0x95   : > { %v324_v40 = vld [vmem:[#allocation2 + $0x78] sm:$0xff]  ;;  %v317_v51 = vld [vmem:[#allocation2 + $0x48] sm:$0xff]  ;;  %v323_v58 = vld [vmem:[#allocation2 + $0x70] sm:$0xff] }
  0x96   : > { %1174 = vmatpush3.bf16.msra.mxu0 %v1416_v3  ;;  %1243 = vmatpush3.bf16.msra.mxu1 %v1416_v3  ;;  %v325_v52 = vld [vmem:[#allocation2 + $0x28] sm:$0xff] }
  0x97   : > { %1175 = vmatprep.subr.bf16.mxu0 %v1417_v4  ;;  %1236 = vmatprep.subr.bf16.mxu1 %v1417_v4  ;;  %v315_v57 = vld [vmem:[#allocation2 + $0x68] sm:$0xff] }
  0x9a   : > { %1176 = vmatpush3.bf16.msra.mxu0 %v1417_v4  ;;  %1244 = vmatpush3.bf16.msra.mxu1 %v1417_v4 }
  0x9b   : > { %1177 = vmatprep.subr.bf16.mxu0 %v1418_v7  ;;  %1237 = vmatprep.subr.bf16.mxu1 %v1418_v7 }
  0x9e   : > { %1178 = vmatpush3.bf16.msra.mxu0 %v1418_v7  ;;  %1245 = vmatpush3.bf16.msra.mxu1 %v1418_v7 }
  0x9f   : > { %1179 = vmatprep.subr.bf16.mxu0 %v1419_v8  ;;  %1238 = vmatprep.subr.bf16.mxu1 %v1419_v8 }
  0xa2   : > { %1180 = vmatpush3.bf16.msra.mxu0 %v1419_v8  ;;  %1246 = vmatpush3.bf16.msra.mxu1 %v1419_v8 }
  0xa3   : > { %1181 = vmatprep.subr.bf16.mxu0 %v1420_v9  ;;  %1239 = vmatprep.subr.bf16.mxu1 %v1420_v9 }
  0xa6   : > { %1182 = vmatpush3.bf16.msra.mxu0 %v1420_v9  ;;  %1247 = vmatpush3.bf16.msra.mxu1 %v1420_v9 }
  0xa7   : > { %1183 = vmatprep.subr.bf16.mxu0 %v1421_v10  ;;  %1240 = vmatprep.subr.bf16.mxu1 %v1421_v10 }
  0xaa   : > { %1184 = vmatpush3.bf16.msra.mxu0 %v1421_v10  ;;  %1248 = vmatpush3.bf16.msra.mxu1 %v1421_v10 }
  0xad   : > { %1186 = vmatmul.mubr.bf16.vlgmr.msra.gmra.mxu0 %v1424_v11  ;;  %1194 = vmatmul.mubr.bf16.vlgmr.msra.gmra.mxu1 %v1425_v12 }
  0xae   : > { %1189 = vmatprep.mubr.bf16.mxu0 %v1426_v13  ;;  %1197 = vmatprep.mubr.bf16.mxu1 %v1427_v14 }
  0xb5   : > { %1190 = vmatmul.mubr.bf16.gmra.mxu0 %v1428_v15  ;;  %1198 = vmatmul.mubr.bf16.gmra.mxu1 %v1429_v16 }
 0x16d   : > { %v1187_v19 = vpop.f32.mrf.mxu0  ;;  %v1195_v20 = vpop.f32.mrf.mxu1 }
 0x16e   : > { %v553_v23 = vadd.f32 %v1187_v19, %v312_v17  ;;  %v561_v24 = vadd.f32 %v1195_v20, %v320_v18 }
 0x16f   : > { %v488_v25 = vpop.f32.mrf.mxu0  ;;  %v520_v26 = vpop.f32.mrf.mxu1 }
 0x170   : > { %569 = vst [vmem:[#allocation2 + $0x58] sm:$0xff] %v553_v23  ;;  %577 = vst [vmem:[#allocation2 + $0x10] sm:$0xff] %v561_v24  ;;  %v551_v29 = vadd.f32 %v488_v25, %v310_v21  ;;  %v559_v30 = vadd.f32 %v520_v26, %v318_v22 }
 0x171   : > { %v1188_v31 = vpop.f32.mrf.mxu0  ;;  %v1196_v32 = vpop.f32.mrf.mxu1 }
 0x172   : > { %567 = vst [vmem:[#allocation2 + $0x30] sm:$0xff] %v551_v29  ;;  %575 = vst [vmem:[#allocation2 + $0x40] sm:$0xff] %v559_v30  ;;  %v554_v35 = vadd.f32 %v1188_v31, %v313_v27  ;;  %v562_v36 = vadd.f32 %v1196_v32, %v321_v28 }
 0x173   : > { %v491_v37 = vpop.f32.mrf.mxu0  ;;  %v523_v38 = vpop.f32.mrf.mxu1 }
 0x174   : > { %570 = vst [vmem:[#allocation2 + $0x18] sm:$0xff] %v554_v35  ;;  %578 = vst [vmem:[#allocation2 + $0x38] sm:$0xff] %v562_v36  ;;  %v552_v41 = vadd.f32 %v491_v37, %v311_v33  ;;  %v560_v42 = vadd.f32 %v523_v38, %v319_v34 }
 0x175   : > { %v1191_v43 = vpop.f32.mrf.mxu0  ;;  %v1199_v44 = vpop.f32.mrf.mxu1 }
 0x176   : > { %568 = vst [vmem:[#allocation2] sm:$0xff] %v552_v41  ;;  %576 = vst [vmem:[#allocation2 + $0x20] sm:$0xff] %v560_v42  ;;  %v557_v47 = vadd.f32 %v1191_v43, %v316_v39  ;;  %v565_v48 = vadd.f32 %v1199_v44, %v324_v40 }
 0x177   : > { %v504_v49 = vpop.f32.mrf.mxu0  ;;  %v536_v50 = vpop.f32.mrf.mxu1 }
 0x178   : > { %573 = vst [vmem:[#allocation2 + $0x8] sm:$0xff] %v557_v47  ;;  %581 = vst [vmem:[#allocation2 + $0x78] sm:$0xff] %v565_v48  ;;  %v555_v53 = vadd.f32 %v504_v49, %v314_v45  ;;  %v563_v54 = vadd.f32 %v536_v50, %v322_v46 }
 0x179   : > { %v1192_v55 = vpop.f32.mrf.mxu0  ;;  %v1200_v56 = vpop.f32.mrf.mxu1 }
 0x17a   : > { %571 = vst [vmem:[#allocation2 + $0x50] sm:$0xff] %v555_v53  ;;  %579 = vst [vmem:[#allocation2 + $0x60] sm:$0xff] %v563_v54  ;;  %v558_v59 = vadd.f32 %v1192_v55, %v317_v51  ;;  %v566_v60 = vadd.f32 %v1200_v56, %v325_v52  ;;  %586 = sbr.rel (%p1041_p1) target bundleno = 630 (0x276), region = 56 }
 0x17b   : > { %v507_v61 = vpop.f32.mrf.mxu0  ;;  %v539_v62 = vpop.f32.mrf.mxu1 }
 0x17c   : > { %574 = vst [vmem:[#allocation2 + $0x48] sm:$0xff] %v558_v59  ;;  %582 = vst [vmem:[#allocation2 + $0x28] sm:$0xff] %v566_v60  ;;  %v556_v63 = vadd.f32 %v507_v61, %v315_v57  ;;  %v564_v0 = vadd.f32 %v539_v62, %v323_v58 }
 0x17e   : > { %572 = vst [vmem:[#allocation2 + $0x68] sm:$0xff] %v556_v63  ;;  %580 = vst [vmem:[#allocation2 + $0x70] sm:$0xff] %v564_v0 }
 0x17f   : > { %v1430_v1 = vld [vmem:[#allocation8 + $0x38] sm:$0xff]   ;;  %v1431_v2 = vld [vmem:[#allocation8 + $0x30] sm:$0xff]   ;;  %v1432_v3 = vld [vmem:[#allocation8 + $0x28] sm:$0xff]  }
 0x180   : > { %1201 = vmatprep.subr.bf16.mxu0 %v1430_v1  ;;  %1249 = vmatprep.subr.bf16.mxu1 %v1430_v1  ;;  %v1433_v4 = vld [vmem:[#allocation8 + $0x20] sm:$0xff]   ;;  %v587_v5 = vld [vmem:[#allocation2 + $0x30] sm:$0xff]  ;;  %v1434_v11 = vld [vmem:[#allocation8 + $0x18] sm:$0xff]  }
 0x181   : > { %1202 = vmatpush3.bf16.msra.mxu0 %v1430_v1  ;;  %1257 = vmatpush3.bf16.msra.mxu1 %v1430_v1  ;;  %v588_v6 = vld [vmem:[#allocation2] sm:$0xff]  ;;  %v1435_v12 = vld [vmem:[#allocation8 + $0x10] sm:$0xff]   ;;  %v1436_v13 = vld [vmem:[#allocation8 + $0x8] sm:$0xff]  }
 0x182   : > { %1203 = vmatprep.subr.bf16.mxu0 %v1431_v2  ;;  %1250 = vmatprep.subr.bf16.mxu1 %v1431_v2  ;;  %v595_v7 = vld [vmem:[#allocation2 + $0x40] sm:$0xff]  ;;  %v603_v8 = vpack.c.bf16 %v588_v6, %v587_v5  ;;  %v589_v15 = vld [vmem:[#allocation2 + $0x58] sm:$0xff]  ;;  %v597_v17 = vld [vmem:[#allocation2 + $0x10] sm:$0xff] }
 0x183   : > { %v596_v9 = vld [vmem:[#allocation2 + $0x20] sm:$0xff]  ;;  %v590_v16 = vld [vmem:[#allocation2 + $0x18] sm:$0xff]  ;;  %v591_v19 = vld [vmem:[#allocation2 + $0x50] sm:$0xff] }
 0x184   : > { %v607_v10 = vpack.c.bf16 %v596_v9, %v595_v7  ;;  %1217 = vmatprep.mubr.bf16.mxu0 %v603_v8  ;;  %v1437_v14 = vld [vmem:[#allocation8] sm:$0xff]   ;;  %v598_v18 = vld [vmem:[#allocation2 + $0x38] sm:$0xff]  ;;  %v604_v23 = vpack.c.bf16 %v590_v16, %v589_v15  ;;  %v593_v27 = vld [vmem:[#allocation2 + $0x8] sm:$0xff] }
 0x185   : > { %1204 = vmatpush3.bf16.msra.mxu0 %v1431_v2  ;;  %1258 = vmatpush3.bf16.msra.mxu1 %v1431_v2  ;;  %v592_v20 = vld [vmem:[#allocation2 + $0x68] sm:$0xff]  ;;  %v599_v21 = vld [vmem:[#allocation2 + $0x60] sm:$0xff]  ;;  %v600_v22 = vld [vmem:[#allocation2 + $0x70] sm:$0xff]  ;;  %v608_v24 = vpack.c.bf16 %v598_v18, %v597_v17 }
 0x186   : > { %1205 = vmatprep.subr.bf16.mxu0 %v1432_v3  ;;  %1251 = vmatprep.subr.bf16.mxu1 %v1432_v3  ;;  %v605_v25 = vpack.c.bf16 %v592_v20, %v591_v19  ;;  %v609_v26 = vpack.c.bf16 %v600_v22, %v599_v21  ;;  %v594_v28 = vld [vmem:[#allocation2 + $0x48] sm:$0xff]  ;;  %v601_v29 = vld [vmem:[#allocation2 + $0x78] sm:$0xff]  ;;  %v1042_v33 = vld [vmem:[%s2107_s3] ss:$0 sm:$0xff] }
 0x187   : > { %1225 = vmatprep.mubr.bf16.mxu1 %v607_v10  ;;  %v602_v30 = vld [vmem:[#allocation2 + $0x28] sm:$0xff]  ;;  %v606_v31 = vpack.c.bf16 %v594_v28, %v593_v27 }
 0x188   : > { %v610_v32 = vpack.c.bf16 %v602_v30, %v601_v29 }
 0x189   : > { %1206 = vmatpush3.bf16.msra.mxu0 %v1432_v3  ;;  %1259 = vmatpush3.bf16.msra.mxu1 %v1432_v3 }
 0x18a   : > { %1207 = vmatprep.subr.bf16.mxu0 %v1433_v4  ;;  %1252 = vmatprep.subr.bf16.mxu1 %v1433_v4 }
 0x18d   : > { %1208 = vmatpush3.bf16.msra.mxu0 %v1433_v4  ;;  %1260 = vmatpush3.bf16.msra.mxu1 %v1433_v4 }
 0x18e   : > { %1209 = vmatprep.subr.bf16.mxu0 %v1434_v11  ;;  %1253 = vmatprep.subr.bf16.mxu1 %v1434_v11 }
 0x191   : > { %1210 = vmatpush3.bf16.msra.mxu0 %v1434_v11  ;;  %1261 = vmatpush3.bf16.msra.mxu1 %v1434_v11 }
 0x192   : > { %1211 = vmatprep.subr.bf16.mxu0 %v1435_v12  ;;  %1254 = vmatprep.subr.bf16.mxu1 %v1435_v12 }
 0x195   : > { %1212 = vmatpush3.bf16.msra.mxu0 %v1435_v12  ;;  %1262 = vmatpush3.bf16.msra.mxu1 %v1435_v12 }
 0x196   : > { %1213 = vmatprep.subr.bf16.mxu0 %v1436_v13  ;;  %1255 = vmatprep.subr.bf16.mxu1 %v1436_v13 }
 0x199   : > { %1214 = vmatpush3.bf16.msra.mxu0 %v1436_v13  ;;  %1263 = vmatpush3.bf16.msra.mxu1 %v1436_v13 }
 0x19a   : > { %1215 = vmatprep.subr.bf16.mxu0 %v1437_v14  ;;  %1256 = vmatprep.subr.bf16.mxu1 %v1437_v14 }
 0x19d   : > { %1216 = vmatpush3.bf16.msra.mxu0 %v1437_v14  ;;  %1264 = vmatpush3.bf16.msra.mxu1 %v1437_v14 }
 0x1a0   : > { %1218 = vmatmul.mubr.bf16.vlgmr.msra.gmra.mxu0 %v604_v23  ;;  %1226 = vmatmul.mubr.bf16.vlgmr.msra.gmra.mxu1 %v608_v24 }
 0x1a1   : > { %1221 = vmatprep.mubr.bf16.mxu0 %v605_v25  ;;  %1229 = vmatprep.mubr.bf16.mxu1 %v609_v26 }
 0x1a8   : > { %1222 = vmatmul.mubr.bf16.gmra.mxu0 %v606_v31  ;;  %1230 = vmatmul.mubr.bf16.gmra.mxu1 %v610_v32 }
 0x260   : > { %v1219_v34 = vpop.f32.mrf.mxu0  ;;  %v1227_v35 = vpop.f32.mrf.mxu1 }
 0x261   : > { %v725_v36 = vadd.f32 %v1219_v34, %v1042_v33  ;;  %v757_v37 = vadd.f32 %v1227_v35, %v1042_v33 }
 0x262   : > { %v716_v38 = vpop.f32.mrf.mxu0  ;;  %v748_v39 = vpop.f32.mrf.mxu1 }
 0x263   : > { %v717_v40 = vadd.f32 %v1042_v33, %v716_v38  ;;  %v749_v41 = vadd.f32 %v1042_v33, %v748_v39  ;;  %v781_v46 = vmax.f32 %v725_v36, 0.0  ;;  %v789_v47 = vmax.f32 %v757_v37, 0.0 }
 0x264   : > { %v1220_v42 = vpop.f32.mrf.mxu0  ;;  %v1228_v43 = vpop.f32.mrf.mxu1 }
 0x265   : > { %v728_v44 = vadd.f32 %v1220_v42, %v1042_v33  ;;  %v760_v45 = vadd.f32 %v1228_v43, %v1042_v33  ;;  %v779_v54 = vmax.f32 %v717_v40, 0.0  ;;  %v787_v55 = vmax.f32 %v749_v41, 0.0 }
 0x266   : > { %v719_v48 = vpop.f32.mrf.mxu0  ;;  %v751_v49 = vpop.f32.mrf.mxu1 }
 0x267   : > { %v782_v50 = vmax.f32 %v728_v44, 0.0  ;;  %v790_v51 = vmax.f32 %v760_v45, 0.0  ;;  %v720_v52 = vadd.f32 %v1042_v33, %v719_v48  ;;  %v752_v53 = vadd.f32 %v1042_v33, %v751_v49 }
 0x268   : > { %v1223_v56 = vpop.f32.mrf.mxu0  ;;  %v1231_v57 = vpop.f32.mrf.mxu1 }
 0x269   : > { %v1098_v58 = vpack.c.bf16 %v782_v50, %v781_v46  ;;  %v1118_v59 = vpack.c.bf16 %v790_v51, %v789_v47  ;;  %v780_v60 = vmax.f32 %v720_v52, 0.0  ;;  %v788_v61 = vmax.f32 %v752_v53, 0.0 }
 0x26a   : > { %v741_v62 = vadd.f32 %v1223_v56, %v1042_v33  ;;  %v773_v63 = vadd.f32 %v1231_v57, %v1042_v33  ;;  %v732_v0 = vpop.f32.mrf.mxu0  ;;  %v764_v1 = vpop.f32.mrf.mxu1 }
 0x26b   : > { %1130 = vst [vmem:[%s1933_s12 + $0x8] sm:$0xff] %v1098_v58   ;;  %1134 = vst [vmem:[%s1933_s12 + $0x28] sm:$0xff] %v1118_v59   ;;  %v1093_v2 = vpack.c.bf16 %v780_v60, %v779_v54  ;;  %v1113_v3 = vpack.c.bf16 %v788_v61, %v787_v55  ;;  %v733_v4 = vadd.f32 %v1042_v33, %v732_v0 }
 0x26c   : > { %v765_v5 = vadd.f32 %v1042_v33, %v764_v1  ;;  %v1224_v6 = vpop.f32.mrf.mxu0  ;;  %v1232_v7 = vpop.f32.mrf.mxu1  ;;  %v785_v10 = vmax.f32 %v741_v62, 0.0  ;;  %v793_v11 = vmax.f32 %v773_v63, 0.0 }
 0x26d   : > { %1094 = vst [vmem:[%s1933_s12] sm:$0xff] %v1093_v2   ;;  %1133 = vst [vmem:[%s1933_s12 + $0x20] sm:$0xff] %v1113_v3   ;;  %v744_v8 = vadd.f32 %v1224_v6, %v1042_v33  ;;  %v776_v9 = vadd.f32 %v1232_v7, %v1042_v33  ;;  %v783_v18 = vmax.f32 %v733_v4, 0.0 }
 0x26e   : > { %v735_v12 = vpop.f32.mrf.mxu0  ;;  %v767_v13 = vpop.f32.mrf.mxu1  ;;  %v791_v19 = vmax.f32 %v765_v5, 0.0 }
 0x26f   : > { %v786_v14 = vmax.f32 %v744_v8, 0.0  ;;  %v794_v15 = vmax.f32 %v776_v9, 0.0  ;;  %v736_v16 = vadd.f32 %v1042_v33, %v735_v12  ;;  %v768_v17 = vadd.f32 %v1042_v33, %v767_v13 }
 0x271   : > { %v1108_v20 = vpack.c.bf16 %v786_v14, %v785_v10  ;;  %v1128_v21 = vpack.c.bf16 %v794_v15, %v793_v11  ;;  %v784_v22 = vmax.f32 %v736_v16, 0.0  ;;  %v792_v23 = vmax.f32 %v768_v17, 0.0 }
 0x273   : > { %1132 = vst [vmem:[%s1933_s12 + $0x18] sm:$0xff] %v1108_v20   ;;  %1136 = vst [vmem:[%s1933_s12 + $0x38] sm:$0xff] %v1128_v21   ;;  %v1103_v24 = vpack.c.bf16 %v784_v22, %v783_v18  ;;  %v1123_v25 = vpack.c.bf16 %v792_v23, %v791_v19 }
 0x275   : > { %1131 = vst [vmem:[%s1933_s12 + $0x10] sm:$0xff] %v1103_v24   ;;  %1135 = vst [vmem:[%s1933_s12 + $0x30] sm:$0xff] %v1123_v25  }
 0x276 PF: > { %s2108_s24 = sld [smem:[#allocation17_spill]]  ;;  %s889_s6 = sshll.u32 %s1933_s12, 4  ;;  %s1971_s6 = int_to_ptr.vmem [resolvable:$true] %s889_s6 }
 0x277   : > { %s2110_s9 = sld [smem:[#allocation20_spill]]  ;;  %s1975_s11 = scalar_lea.sflag [#allocation5], %s283_s29 }
 0x278   : > { %s2111_s10 = sld [smem:[#allocation25_spill]]  ;;  %s1520_s30 = scalar_lea.vmem %s1971_s6, 1024 }
 0x279   : > { %p1521_p5 = scmp.ne.s32.totalorder %s1971_s6, %s1520_s30  ;;  %s1681_s14 = smov [#allocation9]  }
 0x27a   : > { %s1524_s5 = sshll.u32 %s1681_s14, 4  ;;  %s1525_s5 = int_to_ptr.vmem [resolvable:$false] %s1524_s5 }
 0x27b   : > { %s1526_s2 = scalar_lea.vmem %s1525_s5, 2048  ;;  %p1527_p9 = scmp.lt.s32.totalorder %s1971_s6, %s1525_s5 }
 0x27c   : > { %s1089_s25 = sshll.u32 %s2108_s24, 10  ;;  %p1528_p4 = scmp.lt.s32.totalorder %s1526_s2, %s1520_s30 }
 0x27d   : > { %p2112_p11 = scmp.ne.s32.totalorder %s2110_s9, 0 }
 0x27e   : > { %s1968_s16 = scalar_lea.hbm %s2111_s10, %s1089_s25  ;;  %p1529_p12 = por %p1528_p4, %p1527_p9 }
 0x27f   : > { %p1522_p0 = pnand %p1521_p5, %p2112_p11 }
 0x281   : > { %p1523_p8 = pneg %p1522_p0 }
 0x283   : > { %p1530_p6 = pnand %p1529_p12, %p1523_p8 }
 0x285   : > { %1533 = shalt.err (!%p1530_p6)
}
 0x286   : > { %s1534_s29 = scalar_lea.hbm %s1968_s16, 1024  ;;  %s1538_s24 = scalar_lea.hbm %s2111_s10, 3072 }
 0x287   : > { %p1535_p7 = scmp.ne.s32.totalorder %s1968_s16, %s1534_s29  ;;  %p1539_p10 = scmp.lt.s32.totalorder %s1968_s16, %s2111_s10 }
 0x288   : > { %p1540_p3 = scmp.lt.s32.totalorder %s1538_s24, %s1534_s29 }
 0x289   : > { %p1536_p13 = pnand %p1535_p7, %p2112_p11 }
 0x28a   : > { %p1541_p1 = por %p1540_p3, %p1539_p10 }
 0x28b   : > { %p1537_p2 = pneg %p1536_p13 }
 0x28d   : > { %p1542_p5 = pnand %p1541_p1, %p1537_p2 }
 0x28f   : > { %1545 = shalt.err (!%p1542_p5)
}
 0x290   : > { %s1682_s7 = smov 64   ;;  %s1683_s8 = smov 4  }
 0x291   : > { %1274 = dma.vmem_to_hbm [thread:$0]  (%p2112_p11), %s1971_s6, 1024, %s1968_s16, %s1975_s11, %s1682_s7, %s1682_s7, %s1683_s8  }
 0x292 PF: > { %s2113_s30 = sld [smem:[#allocation14_spill]]  ;;  %p1294_p0 = scmp.ge.s32.totalorder %s1672_s28, 2 }
 0x293   : > { %s2114_s14 = sld [smem:[#allocation21_spill]] }
 0x298   : > { %s904_s5 = sand.u32 1, %s2113_s30  }
 0x299   : > { %p2115_p8 = scmp.ne.s32.totalorder %s2114_s14, 0  ;;  %s905_s2 = scalar_lea.sflag [#allocation5], %s904_s5 }
 0x29b   : > { %p1288_p9 = pnand %p1294_p0, %p2115_p8 }
 0x29d   : > { %p1289_p4 = pneg %p1288_p9 }
 0x29f   : > { %1615 = dma.done.wait (%p1289_p4), %s905_s2, 1024  }
 0x2a0   : > { %1617 = vsyncadd (%p1289_p4), %s905_s2, 4294966272  ;;  %s23_s28 = sadd.s32 1, %s1672_s28   ;;  %s2117_s9 = sld [smem:[#allocation15_spill]] }
 0x2a1   : > { %p2003_p12 = scmp.ge.s32.totalorder %s23_s28, 11   ;;  %s2118_s6 = smov %s1855_s15 }
 0x2a2   : > { %s2119_s11 = sld [smem:[#allocation22_spill]]  ;;  %s2121_s16 = smov %s1628_s17 }
 0x2a3   : > { %s2122_s17 = smov %s2118_s6  ;;  %s2123_s18 = smov %s1636_s19 }
 0x2a4   : > { %s2124_s19 = smov %s1640_s20  ;;  %s2125_s20 = smov %s1885_s21 }
 0x2a5   : > { %s2126_s21 = smov %s1648_s22  ;;  %s2127_s22 = smov %s1652_s23 }
 0x2a6   : > { %s2120_s15 = smov %s2117_s9  ;;  %s2128_s23 = smov %s1858_s4 }
 0x2a7   : > { %s2129_s24 = smov %s1664_s26  ;;  %s2130_s25 = smov %s1668_s27 }
 0x2a8   : > { %s2131_s26 = smov %s2119_s11  ;;  %s2132_s27 = smov %s2138_s13 }
 0x2a9   :  { %22 = sbr.rel (!%p2003_p12) target bundleno = 16 (0x10), region = 106 }
 0x2ae   :  { %910 = vsyncpa [#allocation4], 1 }
 0x2af   :  { %912 = vsyncpa [#allocation4 + $0x1], 1 }
 0x2b0   :  { %913 = vsyncpa [#allocation7], 1 }
 0x2b1   :  { %915 = vsyncpa [#allocation7 + $0x1], 1 }
 0x2b2   :  { %916 = vsyncpa [#allocation5], 1 }
 0x2b3   :  { %918 = vsyncpa [#allocation5 + $0x1], 1 }

</bundles_post_ra>
